<compile_context>
chip_gen: v6e
topology: v6e:2x2x1
jax: 0.10.0
libtpu: 0.0.40
codegen_flags: <defaults>
</compile_context>

<pallas_src>
import functools
import math

import jax
import jax.numpy as jnp
from jax.experimental import pallas as pl
from jax.experimental.pallas import tpu as pltpu


def _round_up(n, m):
    return ((n + m - 1) // m) * m


def _soft_one_hot_kernel(x_ref, c_ref, o_ref, *, gamma):
    # x_ref: (TM, 1)   -- one scalar per row (lane-broadcast below)
    # c_ref: (1, steps) -- class centers on the lane axis (sublane-broadcast)
    # o_ref: (TM, steps)
    x = x_ref[...]
    c = c_ref[...]
    d = x - c                      # (TM, steps) via broadcast
    o_ref[...] = jnp.exp((-gamma) * (d * d))   # exp -> EUP slot


def soft_one_hot_forward(x, x_min, x_max, steps, gamma=10.0,
                         target_block_bytes=2 << 20):
    """Pallas equivalent of soft_one_hot.forward: returns x.shape + (steps,)."""
    assert x_min < x_max, "x_min is larger than x_max"
    orig_shape = x.shape
    dtype = x.dtype
    itemsize = jnp.dtype(dtype).itemsize

    # Class centers, same formula as the PyTorch module.
    i = jnp.arange(steps, dtype=dtype)
    centers = (x_min * (steps - 1 - i) + x_max * i) / (steps - 1)
    centers = centers.reshape(1, steps).astype(dtype)

    # Flatten to a column vector of rows; steps goes on the lane axis.
    n = math.prod(orig_shape) if orig_shape else 1
    n8 = _round_up(n, 8)

    # Row tile: ~target_block_bytes of output per block, multiple of 8.
    tm = max(8, (target_block_bytes // (steps * itemsize)) // 8 * 8)
    tm = min(tm, n8)
    n_pad = _round_up(n, tm)

    x_flat = x.reshape(-1)
    if n_pad != n:
        x_flat = jnp.pad(x_flat, (0, n_pad - n))
    x2d = x_flat.reshape(n_pad, 1)

    grid = (n_pad // tm,)

    out = pl.pallas_call(
        functools.partial(_soft_one_hot_kernel, gamma=float(gamma)),
        out_shape=jax.ShapeDtypeStruct((n_pad, steps), dtype),
        grid=grid,
        in_specs=[
            pl.BlockSpec((tm, 1), lambda i: (i, 0)),       # x rows tile
            pl.BlockSpec((1, steps), lambda i: (0, 0)),    # centers (resident)
        ],
        out_specs=pl.BlockSpec((tm, steps), lambda i: (i, 0)),
        compiler_params=pltpu.CompilerParams(
            dimension_semantics=("parallel",),
        ),
    )(x2d, centers)

    return out[:n].reshape(*orig_shape, steps)


if __name__ == "__main__":
    key = jax.random.PRNGKey(0)
    # Module expects a 3-D input (B, H, W); output becomes (B, H, W, steps).
    B, H, W = 2, 4, 16
    steps = 16
    x_min, x_max, gamma = -2.0, 2.0, 10.0

    x = jax.random.normal(key, (B, H, W), dtype=jnp.float32)

    y = soft_one_hot_forward(x, x_min, x_max, steps, gamma)
    jax.block_until_ready(y)

    # Pure-JAX reference (mirrors the PyTorch forward).
    i = jnp.arange(steps, dtype=jnp.float32)
    centers_ref = (x_min * (steps - 1 - i) + x_max * i) / (steps - 1)
    y_ref = jnp.exp(-gamma * (x[..., None] - centers_ref) ** 2)

    assert y.shape == (B, H, W, steps) and y.dtype == x.dtype
    assert jnp.allclose(y, y_ref, rtol=1e-6, atol=1e-6)
    print("KERNEL_OK")
</pallas_src>

<mosaic_0001>
module attributes {stable_mosaic.version = 11 : i64} {
  func.func @_soft_one_hot_kernel(%arg0: i32, %arg1: memref<128x1xf32, #tpu.memory_space<vmem>>, %arg2: memref<1x16xf32, #tpu.memory_space<vmem>>, %arg3: memref<128x16xf32, #tpu.memory_space<vmem>>) attributes {dimension_semantics = [#tpu.dimension_semantics<parallel>], iteration_bounds = array<i64: 1>, scalar_prefetch = 0 : i64, scratch_operands = 0 : i64, tpu.core_type = #tpu.core_type<tc>, window_params = [{transform_indices = @transform_0, window_bounds = array<i64: 128, 1>}, {pipeline_mode = #tpu.pipeline_mode<synchronous>, transform_indices = @transform_1, window_bounds = array<i64: 1, 16>}, {transform_indices = @transform_2, window_bounds = array<i64: 128, 16>}]} {
    %c0 = arith.constant 0 : index
    %c0_0 = arith.constant 0 : index
    %0 = vector.load %arg1[%c0, %c0_0] : memref<128x1xf32, #tpu.memory_space<vmem>>, vector<128x1xf32>
    %c0_1 = arith.constant 0 : index
    %c0_2 = arith.constant 0 : index
    %1 = vector.load %arg2[%c0_1, %c0_2] : memref<1x16xf32, #tpu.memory_space<vmem>>, vector<1x16xf32>
    %2 = vector.broadcast %0 : vector<128x1xf32> to vector<128x16xf32>
    %3 = vector.broadcast %1 : vector<1x16xf32> to vector<128x16xf32>
    %4 = arith.subf %2, %3 : vector<128x16xf32>
    %5 = arith.mulf %4, %4 : vector<128x16xf32>
    %cst = arith.constant -1.000000e+01 : f32
    %6 = vector.broadcast %cst : f32 to vector<128x16xf32>
    %7 = arith.mulf %6, %5 : vector<128x16xf32>
    %8 = math.exp %7 : vector<128x16xf32>
    %c0_3 = arith.constant 0 : index
    %c0_4 = arith.constant 0 : index
    %9 = vector.load %arg3[%c0_3, %c0_4] : memref<128x16xf32, #tpu.memory_space<vmem>>, vector<128x16xf32>
    tpu.vector_store %arg3[%c0_3, %c0_4], %8 {strides = array<i32>} : memref<128x16xf32, #tpu.memory_space<vmem>>, vector<128x16xf32>,
    return
  }
  func.func @transform_0(%arg0: i32) -> (i32, i32) {
    %c0_i32 = arith.constant 0 : i32
    %c0_i32_0 = arith.constant 0 : i32
    return %arg0, %c0_i32 : i32, i32
  }
  func.func @transform_1(%arg0: i32) -> (i32, i32) {
    %c0_i32 = arith.constant 0 : i32
    %c0_i32_0 = arith.constant 0 : i32
    %c0_i32_1 = arith.constant 0 : i32
    return %c0_i32, %c0_i32_0 : i32, i32
  }
  func.func @transform_2(%arg0: i32) -> (i32, i32) {
    %c0_i32 = arith.constant 0 : i32
    %c0_i32_0 = arith.constant 0 : i32
    return %arg0, %c0_i32 : i32, i32
  }
}

</mosaic_0001>

<bundles_post_ra>
// kernel: tpu_custom_call.1
= control target key start
LH: loop header
LB: loop body
LE: loop exit
PB: predicated region body
PF: predicated region fallthrough
CT: control target
= control target key end

     0   :  { %v251_v0 = vmov 0   ;;  %vm194_vm0 = vcmask 130048   ;;  %s400_s0 = inlined_call_operand.vmem [shape: f32[128,1], index: 0, kind: input, shape index: {}]   ;;  %s401_s1 = inlined_call_operand.vmem [shape: f32[1,16], index: 1, kind: input, shape index: {}]   ;;  %s402_s2 = inlined_call_operand.vmem [shape: f32[128,16], index: 2, kind: output, shape index: {}]  }
   0x1   :  { %218 = vset.pattern.permute.xlu1 %v251_v0  ;;  %217 = vset.pattern.permute.xlu0 %v251_v0  ;;  %v13_v1 = vld [vmem:[%s400_s0 + $0x10] sm:$0xff]  ;;  %v11_v2 = vld [vmem:[%s400_s0] sm:$0xff]  ;;  %v14_v3 = vld [vmem:[%s400_s0 + $0x18] sm:$0xff] }
   0x2   :  { %40 = vperm.xlu1 %218, %v13_v1   ;;  %30 = vperm.xlu0 %217, %v11_v2   ;;  %v12_v4 = vld [vmem:[%s400_s0 + $0x8] sm:$0xff]  ;;  %v15_v6 = vld [vmem:[%s400_s0 + $0x20] sm:$0xff]  ;;  %v18_v7 = vld [vmem:[%s400_s0 + $0x38] sm:$0xff] }
   0x3   :  { %v16_v5 = vld [vmem:[%s400_s0 + $0x28] sm:$0xff]  ;;  %v17_v8 = vld [vmem:[%s400_s0 + $0x30] sm:$0xff]  ;;  %v19_v10 = vld [vmem:[%s400_s0 + $0x40] sm:$0xff] }
   0x4   :  { %v20_v9 = vld [vmem:[%s400_s0 + $0x48] sm:$0xff]  ;;  %v22_v11 = vld [vmem:[%s400_s0 + $0x58] sm:$0xff]  ;;  %v21_v12 = vld [vmem:[%s400_s0 + $0x50] sm:$0xff] }
   0x5   :  { %v24_v13 = vld [vmem:[%s400_s0 + $0x68] sm:$0xff]  ;;  %v23_v14 = vld [vmem:[%s400_s0 + $0x60] sm:$0xff]  ;;  %v26_v15 = vld [vmem:[%s400_s0 + $0x78] sm:$0xff] }
   0x6   :  { %45 = vperm.xlu1 %218, %v14_v3   ;;  %35 = vperm.xlu0 %217, %v12_v4   ;;  %v25_v16 = vld [vmem:[%s400_s0 + $0x70] sm:$0xff]  ;;  %v318_v17 = vld [vmem:[%s401_s1] ss:$0 sm:$0xff] }
   0xa   :  { %55 = vperm.xlu1 %218, %v16_v5   ;;  %50 = vperm.xlu0 %217, %v15_v6  }
   0xe   :  { %65 = vperm.xlu1 %218, %v18_v7   ;;  %60 = vperm.xlu0 %217, %v17_v8  }
  0x12   :  { %75 = vperm.xlu1 %218, %v20_v9   ;;  %70 = vperm.xlu0 %217, %v19_v10  }
  0x16   :  { %85 = vperm.xlu1 %218, %v22_v11   ;;  %80 = vperm.xlu0 %217, %v21_v12  }
  0x1a   :  { %95 = vperm.xlu1 %218, %v24_v13   ;;  %90 = vperm.xlu0 %217, %v23_v14  }
  0x1e   :  { %105 = vperm.xlu1 %218, %v26_v15   ;;  %100 = vperm.xlu0 %217, %v25_v16  }
  0x7d   :  { %v41_v18 = vpop.permute.xlu1 %40  ;;  %v31_v19 = vpop.permute.xlu0 %30 }
  0x7e   :  { %v116_v20 = vsub.f32 %v41_v18, %v318_v17  ;;  %v114_v21 = vsub.f32 %v31_v19, %v318_v17 }
  0x80   :  { %v132_v22 = vmul.f32 %v116_v20, %v116_v20  ;;  %v130_v23 = vmul.f32 %v114_v21, %v114_v21 }
  0x81   :  { %v46_v24 = vpop.permute.xlu1 %45  ;;  %v36_v25 = vpop.permute.xlu0 %35 }
  0x82   :  { %v148_v26 = vmul.f32 -10.0, %v132_v22  ;;  %v146_v27 = vmul.f32 -10.0, %v130_v23  ;;  %v117_v28 = vsub.f32 %v46_v24, %v318_v17  ;;  %v115_v29 = vsub.f32 %v36_v25, %v318_v17 }
  0x84   :  { %v166_v30 = vmul.f32 1.442695, %v148_v26  ;;  %v162_v31 = vmul.f32 1.442695, %v146_v27  ;;  %v133_v32 = vmul.f32 %v117_v28, %v117_v28  ;;  %v131_v33 = vmul.f32 %v115_v29, %v115_v29 }
  0x85   :  { %v56_v34 = vpop.permute.xlu1 %55  ;;  %v51_v35 = vpop.permute.xlu0 %50 }
  0x86   :  { %219 = vpow2.f32 %v166_v30  ;;  %v149_v36 = vmul.f32 -10.0, %v133_v32  ;;  %v147_v37 = vmul.f32 -10.0, %v131_v33  ;;  %v119_v38 = vsub.f32 %v56_v34, %v318_v17 }
  0x87   :  { %221 = vpow2.f32 %v162_v31  ;;  %v118_v39 = vsub.f32 %v51_v35, %v318_v17 }
  0x88   :  { %v168_v40 = vmul.f32 1.442695, %v149_v36  ;;  %v164_v41 = vmul.f32 1.442695, %v147_v37  ;;  %v135_v42 = vmul.f32 %v119_v38, %v119_v38 }
  0x89   :  { %v134_v43 = vmul.f32 %v118_v39, %v118_v39  ;;  %v66_v44 = vpop.permute.xlu1 %65  ;;  %v61_v45 = vpop.permute.xlu0 %60 }
  0x8a   :  { %223 = vpow2.f32 %v168_v40  ;;  %v151_v46 = vmul.f32 -10.0, %v135_v42  ;;  %v121_v47 = vsub.f32 %v66_v44, %v318_v17  ;;  %v120_v48 = vsub.f32 %v61_v45, %v318_v17 }
  0x8b   :  { %225 = vpow2.f32 %v164_v41  ;;  %v150_v49 = vmul.f32 -10.0, %v134_v43 }
  0x8c   :  { %v172_v50 = vmul.f32 1.442695, %v151_v46  ;;  %v137_v51 = vmul.f32 %v121_v47, %v121_v47  ;;  %v136_v52 = vmul.f32 %v120_v48, %v120_v48 }
  0x8d   :  { %v170_v53 = vmul.f32 1.442695, %v150_v49  ;;  %v76_v54 = vpop.permute.xlu1 %75  ;;  %v71_v55 = vpop.permute.xlu0 %70 }
  0x8e   :  { %227 = vpow2.f32 %v172_v50  ;;  %v153_v56 = vmul.f32 -10.0, %v137_v51  ;;  %v152_v57 = vmul.f32 -10.0, %v136_v52  ;;  %v123_v58 = vsub.f32 %v76_v54, %v318_v17 }
  0x8f   :  { %229 = vpow2.f32 %v170_v53  ;;  %v122_v59 = vsub.f32 %v71_v55, %v318_v17 }
  0x90   :  { %v176_v60 = vmul.f32 1.442695, %v153_v56  ;;  %v174_v61 = vmul.f32 1.442695, %v152_v57  ;;  %v139_v62 = vmul.f32 %v123_v58, %v123_v58 }
  0x91   :  { %v138_v63 = vmul.f32 %v122_v59, %v122_v59  ;;  %v86_v0 = vpop.permute.xlu1 %85  ;;  %v81_v1 = vpop.permute.xlu0 %80 }
  0x92   :  { %231 = vpow2.f32 %v176_v60  ;;  %v155_v2 = vmul.f32 -10.0, %v139_v62  ;;  %v125_v3 = vsub.f32 %v86_v0, %v318_v17  ;;  %v124_v4 = vsub.f32 %v81_v1, %v318_v17 }
  0x93   :  { %v220_v5 = vpop.eup %219  ;;  %233 = vpow2.f32 %v174_v61  ;;  %v154_v6 = vmul.f32 -10.0, %v138_v63 }
  0x94   :  { %v222_v7 = vpop.eup %221  ;;  %197 = vst.msk [vmem:[%s402_s2 + $0x10] sm:$0xff] %vm194_vm0, %v220_v5  ;;  %v180_v8 = vmul.f32 1.442695, %v155_v2  ;;  %v141_v9 = vmul.f32 %v125_v3, %v125_v3  ;;  %v140_v10 = vmul.f32 %v124_v4, %v124_v4 }
  0x95   :  { %195 = vst.msk [vmem:[%s402_s2] sm:$0xff] %vm194_vm0, %v222_v7  ;;  %v178_v11 = vmul.f32 1.442695, %v154_v6  ;;  %v96_v12 = vpop.permute.xlu1 %95  ;;  %v91_v13 = vpop.permute.xlu0 %90 }
  0x96   :  { %235 = vpow2.f32 %v180_v8  ;;  %v157_v14 = vmul.f32 -10.0, %v141_v9  ;;  %v156_v15 = vmul.f32 -10.0, %v140_v10  ;;  %v127_v16 = vsub.f32 %v96_v12, %v318_v17 }
  0x97   :  { %v224_v18 = vpop.eup %223  ;;  %237 = vpow2.f32 %v178_v11  ;;  %v126_v19 = vsub.f32 %v91_v13, %v318_v17 }
  0x98   :  { %v226_v20 = vpop.eup %225  ;;  %198 = vst.msk [vmem:[%s402_s2 + $0x18] sm:$0xff] %vm194_vm0, %v224_v18  ;;  %v184_v21 = vmul.f32 1.442695, %v157_v14  ;;  %v182_v22 = vmul.f32 1.442695, %v156_v15  ;;  %v143_v23 = vmul.f32 %v127_v16, %v127_v16 }
  0x99   :  { %196 = vst.msk [vmem:[%s402_s2 + $0x8] sm:$0xff] %vm194_vm0, %v226_v20  ;;  %v142_v24 = vmul.f32 %v126_v19, %v126_v19  ;;  %v106_v25 = vpop.permute.xlu1 %105  ;;  %v101_v26 = vpop.permute.xlu0 %100 }
  0x9a   :  { %239 = vpow2.f32 %v184_v21  ;;  %v159_v27 = vmul.f32 -10.0, %v143_v23  ;;  %v129_v28 = vsub.f32 %v106_v25, %v318_v17  ;;  %v128_v29 = vsub.f32 %v101_v26, %v318_v17 }
  0x9b   :  { %v228_v30 = vpop.eup %227  ;;  %241 = vpow2.f32 %v182_v22  ;;  %v158_v31 = vmul.f32 -10.0, %v142_v24 }
  0x9c   :  { %v230_v32 = vpop.eup %229  ;;  %200 = vst.msk [vmem:[%s402_s2 + $0x28] sm:$0xff] %vm194_vm0, %v228_v30  ;;  %v188_v33 = vmul.f32 1.442695, %v159_v27  ;;  %v145_v34 = vmul.f32 %v129_v28, %v129_v28  ;;  %v144_v35 = vmul.f32 %v128_v29, %v128_v29 }
  0x9d   :  { %199 = vst.msk [vmem:[%s402_s2 + $0x20] sm:$0xff] %vm194_vm0, %v230_v32  ;;  %v186_v36 = vmul.f32 1.442695, %v158_v31 }
  0x9e   :  { %243 = vpow2.f32 %v188_v33  ;;  %v161_v17 = vmul.f32 -10.0, %v145_v34  ;;  %v160_v37 = vmul.f32 -10.0, %v144_v35 }
  0x9f   :  { %v232_v38 = vpop.eup %231  ;;  %245 = vpow2.f32 %v186_v36 }
  0xa0   :  { %v234_v39 = vpop.eup %233  ;;  %202 = vst.msk [vmem:[%s402_s2 + $0x38] sm:$0xff] %vm194_vm0, %v232_v38  ;;  %v192_v40 = vmul.f32 1.442695, %v161_v17  ;;  %v190_v41 = vmul.f32 1.442695, %v160_v37 }
  0xa1   :  { %201 = vst.msk [vmem:[%s402_s2 + $0x30] sm:$0xff] %vm194_vm0, %v234_v39 }
  0xa2   :  { %247 = vpow2.f32 %v192_v40 }
  0xa3   :  { %v236_v42 = vpop.eup %235  ;;  %249 = vpow2.f32 %v190_v41 }
  0xa4   :  { %v238_v43 = vpop.eup %237  ;;  %204 = vst.msk [vmem:[%s402_s2 + $0x48] sm:$0xff] %vm194_vm0, %v236_v42 }
  0xa5   :  { %203 = vst.msk [vmem:[%s402_s2 + $0x40] sm:$0xff] %vm194_vm0, %v238_v43 }
  0xa7   :  { %v240_v44 = vpop.eup %239 }
  0xa8   :  { %v242_v45 = vpop.eup %241  ;;  %206 = vst.msk [vmem:[%s402_s2 + $0x58] sm:$0xff] %vm194_vm0, %v240_v44 }
  0xa9   :  { %205 = vst.msk [vmem:[%s402_s2 + $0x50] sm:$0xff] %vm194_vm0, %v242_v45 }
  0xab   :  { %v244_v46 = vpop.eup %243 }
  0xac   :  { %v246_v47 = vpop.eup %245  ;;  %208 = vst.msk [vmem:[%s402_s2 + $0x68] sm:$0xff] %vm194_vm0, %v244_v46 }
  0xad   :  { %207 = vst.msk [vmem:[%s402_s2 + $0x60] sm:$0xff] %vm194_vm0, %v246_v47 }
  0xaf   :  { %v248_v48 = vpop.eup %247 }
  0xb0   :  { %v250_v49 = vpop.eup %249  ;;  %210 = vst.msk [vmem:[%s402_s2 + $0x78] sm:$0xff] %vm194_vm0, %v248_v48 }
  0xb1   :  { %209 = vst.msk [vmem:[%s402_s2 + $0x70] sm:$0xff] %vm194_vm0, %v250_v49 }

</bundles_post_ra>
